<compile_context>
chip_gen: v5e
topology: v5e:2x2
jax: 0.10.0
libtpu: 0.0.40
codegen_flags: <defaults>
</compile_context>

<pallas_src>
import math
import numpy as np
import jax
import jax.numpy as jnp
from jax.experimental import pallas as pl
from jax.experimental.pallas import tpu as pltpu


# ---------------------------------------------------------------------------
# Configuration (small shapes consistent with the module's structure)
# ---------------------------------------------------------------------------
EMBEDDING_DIM = 128
HIDDEN_DIMS = [128, 128]          # module default is [512, 256]; scaled down
N_QUBITS = 4
N_LAYERS = 2
BATCH = 2

ROT_DIM = N_QUBITS * N_LAYERS          # 8  (ry / rz / ry2 each)
ENT_DIM = (N_QUBITS - 1) * N_LAYERS    # 6
HEAD_OUT = 3 * ROT_DIM + ENT_DIM       # 30 (real head columns)
HEAD_PAD = 128                         # lane-dense padded head width

HID1, HID2 = HIDDEN_DIMS
W_PACK = HID1 + HID2 + HEAD_PAD        # 384: packed [w1 | w2 | wh_pad] lane axis

MAX_TILE_B = 512                       # batch tile cap (VMEM << limit at this size)


def _round_up(n, m):
    return ((n + m - 1) // m) * m


# ---------------------------------------------------------------------------
# Pallas kernel: full MLP + fused heads + sigmoid + pi scaling
# ---------------------------------------------------------------------------
def predictor_kernel(x_ref, w_ref, b_ref, o_ref):
    # x_ref : (tile_b, 128) f32   (cast to bf16 in-kernel for the MXU)
    # w_ref : (128, 384)    bf16  -> [w1 | w2 | wh_padded] along lanes
    # b_ref : (1, 384)      f32   -> [b1 | b2 | bh_padded(-30)]
    # o_ref : (tile_b, 128) bf16  (lane-dense padded output slab)
    x = x_ref[...].astype(jnp.bfloat16)

    # hidden layer 1: Linear + ReLU (Dropout identity in eval mode)
    h1 = jnp.dot(x, w_ref[:, 0:HID1], preferred_element_type=jnp.float32)
    h1 = jnp.maximum(h1 + b_ref[:, 0:HID1], 0.0)

    # hidden layer 2: Linear + ReLU
    h2 = jnp.dot(h1.astype(jnp.bfloat16), w_ref[:, HID1:HID1 + HID2],
                 preferred_element_type=jnp.float32)
    h2 = jnp.maximum(h2 + b_ref[:, HID1:HID1 + HID2], 0.0)

    # all four parameter heads fused into one (lane-padded) matmul
    logits = jnp.dot(h2.astype(jnp.bfloat16), w_ref[:, HID1 + HID2:W_PACK],
                     preferred_element_type=jnp.float32)
    logits = logits + b_ref[:, HID1 + HID2:W_PACK]

    # sigmoid via EUP exp + EUP approx reciprocal (no VPU divide)
    sig = pl.reciprocal(1.0 + jnp.exp(-logits), approx=True)
    o_ref[...] = (sig * jnp.pi).astype(o_ref.dtype)


def predictor_forward(x, params):
    """Run the fused Pallas kernel and split the padded head output into the
    dict {'ry_params','rz_params','ry2_params','entangling_params'} exactly as
    the PyTorch forward returns."""
    w_packed, b_packed = params
    batch = x.shape[0]

    # bf16-packed batch tile (multiple of 16), power-of-2 bucketed, capped at
    # MAX_TILE_B so large batches run >=2 grid steps ("parallel" -> both TCs
    # on v7x) while small batches stay a single step.
    tile_b = min(MAX_TILE_B, max(16, pl.next_power_of_2(batch)))
    b_pad = _round_up(batch, tile_b)
    if b_pad != batch:
        x = jnp.pad(x, ((0, b_pad - batch), (0, 0)))

    grid = (b_pad // tile_b,)

    cost = pl.CostEstimate(
        flops=2 * b_pad * (EMBEDDING_DIM * HID1 + HID1 * HID2 + HID2 * HEAD_PAD),
        transcendentals=2 * b_pad * HEAD_PAD,                 # exp + reciprocal
        bytes_accessed=(x.size * 4 + w_packed.size * 2
                        + b_packed.size * 4 + b_pad * HEAD_PAD * 2),
    )

    out = pl.pallas_call(
        predictor_kernel,
        out_shape=jax.ShapeDtypeStruct((b_pad, HEAD_PAD), jnp.bfloat16),
        grid=grid,
        in_specs=[
            pl.BlockSpec((tile_b, EMBEDDING_DIM), lambda i: (i, 0)),   # x tile (f32)
            pl.BlockSpec((EMBEDDING_DIM, W_PACK), lambda i: (0, 0)),   # weights (resident)
            pl.BlockSpec((1, W_PACK), lambda i: (0, 0)),               # biases  (resident)
        ],
        out_specs=pl.BlockSpec((tile_b, HEAD_PAD), lambda i: (i, 0)),
        compiler_params=pltpu.CompilerParams(
            dimension_semantics=("parallel",)),
        cost_estimate=cost,
    )(x, w_packed, b_packed)

    # drop batch padding and the zeroed head-padding columns; return f32 like
    # the PyTorch module.  (Downstream code may instead consume `out` raw: the
    # padded columns are ~0 thanks to the -30 pad bias.)
    out = out[:batch, :HEAD_OUT].astype(jnp.float32)
    return {
        "ry_params": out[:, 0:ROT_DIM],
        "rz_params": out[:, ROT_DIM:2 * ROT_DIM],
        "ry2_params": out[:, 2 * ROT_DIM:3 * ROT_DIM],
        "entangling_params": out[:, 3 * ROT_DIM:3 * ROT_DIM + ENT_DIM],
    }


# ---------------------------------------------------------------------------
# Deterministic parameter init (Xavier uniform weights, zero biases),
# matching the module's _initialize_weights(). Packed for the kernel.
# ---------------------------------------------------------------------------
def xavier_uniform(key, fan_in, fan_out):
    bound = math.sqrt(6.0 / (fan_in + fan_out))
    # stored as [in, out] so the kernel does x @ W
    return jax.random.uniform(key, (fan_in, fan_out), jnp.float32, -bound, bound)


def init_params(key):
    k1, k2, k3, k4, k5, k6 = jax.random.split(key, 6)
    w1 = xavier_uniform(k1, EMBEDDING_DIM, HID1)
    w2 = xavier_uniform(k2, HID1, HID2)
    # separate heads (as in the module), concatenated along the output axis
    w_ry = xavier_uniform(k3, HID2, ROT_DIM)
    w_rz = xavier_uniform(k4, HID2, ROT_DIM)
    w_ry2 = xavier_uniform(k5, HID2, ROT_DIM)
    w_ent = xavier_uniform(k6, HID2, ENT_DIM)
    wh = jnp.concatenate([w_ry, w_rz, w_ry2, w_ent], axis=1)          # (128, 30)
    wh_pad = jnp.pad(wh, ((0, 0), (0, HEAD_PAD - HEAD_OUT)))          # (128, 128)

    # pack weights along the lane axis: [w1 | w2 | wh_pad] -> (128, 384) bf16
    w_packed = jnp.concatenate([w1, w2, wh_pad], axis=1).astype(jnp.bfloat16)

    # biases: zero-init (as in the module) for real columns; padded head
    # columns get -30 so sigmoid(-30)*pi ~ 0 and the raw padded slab is safe.
    b_packed = jnp.zeros((W_PACK,), jnp.float32)
    b_packed = b_packed.at[HID1 + HID2 + HEAD_OUT:].set(-30.0)
    b_packed = b_packed.reshape(1, W_PACK)
    return (w_packed, b_packed)


# ---------------------------------------------------------------------------
# Pure-JAX reference (same bf16 operand rounding as the kernel's MXU inputs;
# f32 accumulation).  Note: this validates bf16-vs-bf16 numerics; deviation
# from a true fp32 PyTorch forward is slightly larger but within tolerance
# for Xavier-scale weights.
# ---------------------------------------------------------------------------
def reference_forward(x, params):
    w_packed, b_packed = params
    w = w_packed.astype(jnp.float32)
    w1 = w[:, 0:HID1]
    w2 = w[:, HID1:HID1 + HID2]
    wh = w[:, HID1 + HID2:HID1 + HID2 + HEAD_OUT]
    b1 = b_packed[:, 0:HID1]
    b2 = b_packed[:, HID1:HID1 + HID2]
    bh = b_packed[:, HID1 + HID2:HID1 + HID2 + HEAD_OUT]

    xf = x.astype(jnp.bfloat16).astype(jnp.float32)
    h1 = jnp.maximum(xf @ w1 + b1, 0.0).astype(jnp.bfloat16).astype(jnp.float32)
    h2 = jnp.maximum(h1 @ w2 + b2, 0.0).astype(jnp.bfloat16).astype(jnp.float32)
    out = jax.nn.sigmoid(h2 @ wh + bh) * jnp.pi
    return {
        "ry_params": out[:, 0:ROT_DIM],
        "rz_params": out[:, ROT_DIM:2 * ROT_DIM],
        "ry2_params": out[:, 2 * ROT_DIM:3 * ROT_DIM],
        "entangling_params": out[:, 3 * ROT_DIM:3 * ROT_DIM + ENT_DIM],
    }


if __name__ == "__main__":
    key = jax.random.PRNGKey(0)
    k_param, k_x = jax.random.split(key)
    params = init_params(k_param)
    x = jax.random.normal(k_x, (BATCH, EMBEDDING_DIM), jnp.float32)

    out = predictor_forward(x, params)
    jax.block_until_ready(out)

    ref = reference_forward(x, params)
    for name in ("ry_params", "rz_params", "ry2_params", "entangling_params"):
        np.testing.assert_allclose(np.asarray(out[name]), np.asarray(ref[name]),
                                   rtol=2e-2, atol=2e-2)
        # parameters must lie in [0, pi] (parameter_range='pi'); bf16 rounding
        # of sigmoid*pi never exceeds pi (nearest bf16 below pi is 3.140625).
        assert np.all(np.asarray(out[name]) >= 0.0)
        assert np.all(np.asarray(out[name]) <= np.pi)
        assert np.all(np.isfinite(np.asarray(out[name])))

    # shape checks matching the module's validate_parameters()
    assert out["ry_params"].shape == (BATCH, ROT_DIM)
    assert out["rz_params"].shape == (BATCH, ROT_DIM)
    assert out["ry2_params"].shape == (BATCH, ROT_DIM)
    assert out["entangling_params"].shape == (BATCH, ENT_DIM)

    print("KERNEL_OK")
</pallas_src>

<mosaic_0001>
module attributes {stable_mosaic.version = 11 : i64} {
  func.func @predictor_kernel(%arg0: i32, %arg1: memref<16x128xf32, #tpu.memory_space<vmem>>, %arg2: memref<128x384xbf16, #tpu.memory_space<vmem>>, %arg3: memref<1x384xf32, #tpu.memory_space<vmem>>, %arg4: memref<16x128xbf16, #tpu.memory_space<vmem>>) attributes {dimension_semantics = [#tpu.dimension_semantics<parallel>], iteration_bounds = array<i64: 1>, scalar_prefetch = 0 : i64, scratch_operands = 0 : i64, tpu.core_type = #tpu.core_type<tc>, window_params = [{transform_indices = @transform_0, window_bounds = array<i64: 16, 128>}, {pipeline_mode = #tpu.pipeline_mode<synchronous>, transform_indices = @transform_1, window_bounds = array<i64: 128, 384>}, {pipeline_mode = #tpu.pipeline_mode<synchronous>, transform_indices = @transform_2, window_bounds = array<i64: 1, 384>}, {transform_indices = @transform_3, window_bounds = array<i64: 16, 128>}]} {
    %c0 = arith.constant 0 : index
    %c0_0 = arith.constant 0 : index
    %0 = vector.load %arg1[%c0, %c0_0] : memref<16x128xf32, #tpu.memory_space<vmem>>, vector<16x128xf32>
    %1 = arith.truncf %0 : vector<16x128xf32> to vector<16x128xbf16>
    %c0_1 = arith.constant 0 : index
    %c0_2 = arith.constant 0 : index
    %2 = vector.load %arg2[%c0_1, %c0_2] : memref<128x384xbf16, #tpu.memory_space<vmem>>, vector<128x128xbf16>
    %cst = arith.constant dense<0.000000e+00> : vector<16x128xf32>
    %3 = tpu.matmul %1, %2, %cst {dimension_numbers = #tpu.dot_dimension_numbers<[1], [0], [0], [1], [0, 0, 1, 1], [], []>} : vector<16x128xbf16>, vector<128x128xbf16>, vector<16x128xf32> -> vector<16x128xf32>
    %c0_3 = arith.constant 0 : index
    %c0_4 = arith.constant 0 : index
    %4 = vector.load %arg3[%c0_3, %c0_4] : memref<1x384xf32, #tpu.memory_space<vmem>>, vector<1x128xf32>
    %5 = vector.broadcast %4 : vector<1x128xf32> to vector<16x128xf32>
    %6 = arith.addf %3, %5 : vector<16x128xf32>
    %cst_5 = arith.constant 0.000000e+00 : f32
    %7 = vector.broadcast %cst_5 : f32 to vector<16x128xf32>
    %8 = arith.maximumf %6, %7 : vector<16x128xf32>
    %9 = arith.truncf %8 : vector<16x128xf32> to vector<16x128xbf16>
    %c0_6 = arith.constant 0 : index
    %c128 = arith.constant 128 : index
    %10 = vector.load %arg2[%c0_6, %c128] : memref<128x384xbf16, #tpu.memory_space<vmem>>, vector<128x128xbf16>
    %cst_7 = arith.constant dense<0.000000e+00> : vector<16x128xf32>
    %11 = tpu.matmul %9, %10, %cst_7 {dimension_numbers = #tpu.dot_dimension_numbers<[1], [0], [0], [1], [0, 0, 1, 1], [], []>} : vector<16x128xbf16>, vector<128x128xbf16>, vector<16x128xf32> -> vector<16x128xf32>
    %c0_8 = arith.constant 0 : index
    %c128_9 = arith.constant 128 : index
    %12 = vector.load %arg3[%c0_8, %c128_9] : memref<1x384xf32, #tpu.memory_space<vmem>>, vector<1x128xf32>
    %13 = vector.broadcast %12 : vector<1x128xf32> to vector<16x128xf32>
    %14 = arith.addf %11, %13 : vector<16x128xf32>
    %cst_10 = arith.constant 0.000000e+00 : f32
    %15 = vector.broadcast %cst_10 : f32 to vector<16x128xf32>
    %16 = arith.maximumf %14, %15 : vector<16x128xf32>
    %17 = arith.truncf %16 : vector<16x128xf32> to vector<16x128xbf16>
    %c0_11 = arith.constant 0 : index
    %c256 = arith.constant 256 : index
    %18 = vector.load %arg2[%c0_11, %c256] : memref<128x384xbf16, #tpu.memory_space<vmem>>, vector<128x128xbf16>
    %cst_12 = arith.constant dense<0.000000e+00> : vector<16x128xf32>
    %19 = tpu.matmul %17, %18, %cst_12 {dimension_numbers = #tpu.dot_dimension_numbers<[1], [0], [0], [1], [0, 0, 1, 1], [], []>} : vector<16x128xbf16>, vector<128x128xbf16>, vector<16x128xf32> -> vector<16x128xf32>
    %c0_13 = arith.constant 0 : index
    %c256_14 = arith.constant 256 : index
    %20 = vector.load %arg3[%c0_13, %c256_14] : memref<1x384xf32, #tpu.memory_space<vmem>>, vector<1x128xf32>
    %21 = vector.broadcast %20 : vector<1x128xf32> to vector<16x128xf32>
    %22 = arith.addf %19, %21 : vector<16x128xf32>
    %cst_15 = arith.constant 0.000000e+00 : f32
    %23 = vector.broadcast %cst_15 : f32 to vector<16x128xf32>
    %24 = arith.subf %23, %22 : vector<16x128xf32>
    %25 = math.exp %24 : vector<16x128xf32>
    %cst_16 = arith.constant 1.000000e+00 : f32
    %26 = vector.broadcast %cst_16 : f32 to vector<16x128xf32>
    %27 = arith.addf %26, %25 : vector<16x128xf32>
    %28 = tpu.reciprocal %27 {approx = true} : vector<16x128xf32> -> vector<16x128xf32>
    %cst_17 = arith.constant 3.14159274 : f32
    %29 = vector.broadcast %cst_17 : f32 to vector<16x128xf32>
    %30 = arith.mulf %28, %29 : vector<16x128xf32>
    %31 = arith.truncf %30 : vector<16x128xf32> to vector<16x128xbf16>
    %c0_18 = arith.constant 0 : index
    %c0_19 = arith.constant 0 : index
    %32 = vector.load %arg4[%c0_18, %c0_19] : memref<16x128xbf16, #tpu.memory_space<vmem>>, vector<16x128xbf16>
    tpu.vector_store %arg4[%c0_18, %c0_19], %31 {strides = array<i32>} : memref<16x128xbf16, #tpu.memory_space<vmem>>, vector<16x128xbf16>,
    return
  }
  func.func @transform_0(%arg0: i32) -> (i32, i32) {
    %c0_i32 = arith.constant 0 : i32
    %c0_i32_0 = arith.constant 0 : i32
    return %arg0, %c0_i32 : i32, i32
  }
  func.func @transform_1(%arg0: i32) -> (i32, i32) {
    %c0_i32 = arith.constant 0 : i32
    %c0_i32_0 = arith.constant 0 : i32
    %c0_i32_1 = arith.constant 0 : i32
    return %c0_i32, %c0_i32_0 : i32, i32
  }
  func.func @transform_2(%arg0: i32) -> (i32, i32) {
    %c0_i32 = arith.constant 0 : i32
    %c0_i32_0 = arith.constant 0 : i32
    %c0_i32_1 = arith.constant 0 : i32
    return %c0_i32, %c0_i32_0 : i32, i32
  }
  func.func @transform_3(%arg0: i32) -> (i32, i32) {
    %c0_i32 = arith.constant 0 : i32
    %c0_i32_0 = arith.constant 0 : i32
    return %arg0, %c0_i32 : i32, i32
  }
}

</mosaic_0001>

<bundles_post_ra>
// kernel: tpu_custom_call.1
= control target key start
LH: loop header
LB: loop body
LE: loop exit
PB: predicated region body
PF: predicated region fallthrough
CT: control target
= control target key end

     0   :  { %8 = vsyncpa [#allocation3], 0  ;;  %s641_s0 = inlined_call_operand.hbm [shape: f32[16,128], index: 0, kind: input, shape index: {}]   ;;  %s642_s1 = inlined_call_operand.hbm [shape: bf16[128,384], index: 1, kind: input, shape index: {}]   ;;  %s643_s2 = inlined_call_operand.hbm [shape: f32[1,384], index: 2, kind: input, shape index: {}]   ;;  %s644_s3 = inlined_call_operand.hbm [shape: bf16[16,128], index: 3, kind: output, shape index: {}]  }
   0x1   :  { %9 = vsyncpa [#allocation6], 0  ;;  %s28_s14 = sshll.u32 %s642_s1, 4  ;;  %s29_s14 = int_to_ptr.hbm [resolvable:$true] %s28_s14 }
   0x2   :  { %10 = vsyncpa [#allocation4], 0  ;;  %s599_s15 = smov [#allocation5]   ;;  %s15_s19 = sshll.u32 %s641_s0, 4  ;;  %s16_s19 = int_to_ptr.hbm [resolvable:$true] %s15_s19 }
   0x3   :  { %s30_s16 = sshll.u32 %s599_s15, 4  ;;  %s600_s20 = smov 192   ;;  %s31_s16 = int_to_ptr.vmem [resolvable:$true] %s30_s16 }
   0x4   :  { %s601_s21 = smov 12   ;;  %s602_s22 = smov [#allocation2]  }
   0x5   :  { %36 = dma.hbm_to_vmem [thread:$0]  %s29_s14, 3072, %s31_s16, [#allocation6], %s600_s20, %s600_s20, %s601_s21  }
   0x6   :  { %s17_s23 = sshll.u32 %s602_s22, 4  ;;  %s603_s24 = smov 128   ;;  %s18_s23 = int_to_ptr.vmem [resolvable:$true] %s17_s23 }
   0x7   :  { %s604_s25 = smov 8   ;;  %s42_s27 = sshll.u32 %s643_s2, 4  ;;  %s43_s27 = int_to_ptr.hbm [resolvable:$true] %s42_s27 }
   0x8   :  { %23 = dma.hbm_to_vmem [thread:$0]  %s16_s19, 256, %s18_s23, [#allocation3], %s603_s24, %s603_s24, %s604_s25  }
   0x9   :  { %s605_s28 = smov [#allocation7]  }
   0xa   :  { %s44_s29 = sshll.u32 %s605_s28, 4  ;;  %s45_s29 = int_to_ptr.vmem [resolvable:$true] %s44_s29 }
   0xb   :  { %47 = dma.hbm_to_vmem [thread:$0]  %s43_s27, 48, %s45_s29, [#allocation6]  }
   0xc   :  { %593 = dma.done.wait [#allocation3], 256  }
   0xd   :  { %594 = vsyncadd [#allocation3], 4294967040 }
   0xe   :  { %595 = dma.done.wait [#allocation6], 3120  }
   0xf   :  { %596 = vsyncadd [#allocation6], 4294964176  ;;  %v381_v0 = vld [vmem:[#allocation5 + $0xa8] sm:$0xf]  ;;  %v454_v1 = vld [vmem:[#allocation5 + $0xb0] sm:$0xf0] }
  0x10   :  { %v377_v2 = vld [vmem:[#allocation5 + $0x90] sm:$0xf]  ;;  %v382_v3 = vor.u32 %v454_v1, %v381_v0  ;;  %v453_v4 = vld [vmem:[#allocation5 + $0x98] sm:$0xf0]  ;;  %v373_v6 = vld [vmem:[#allocation5 + $0x78] sm:$0xf] }
  0x11   :  { %v378_v5 = vor.u32 %v453_v4, %v377_v2  ;;  %v452_v7 = vld [vmem:[#allocation5 + $0x80] sm:$0xf0]  ;;  %v413_v8 = vld [vmem:[#allocation5 + $0xac] sm:$0xf]  ;;  %v462_v9 = vld [vmem:[#allocation5 + $0xb4] sm:$0xf0] }
  0x12   :  { %131 = vmatpush.bf16.msra.mxu0 %v382_v3  ;;  %v409_v10 = vld [vmem:[#allocation5 + $0x94] sm:$0xf]  ;;  %v374_v11 = vor.u32 %v452_v7, %v373_v6  ;;  %v414_v12 = vor.u32 %v462_v9, %v413_v8  ;;  %v461_v13 = vld [vmem:[#allocation5 + $0x9c] sm:$0xf0]  ;;  %v451_v15 = vld [vmem:[#allocation5 + $0x68] sm:$0xf0] }
  0x13   :  { %v369_v14 = vld [vmem:[#allocation5 + $0x60] sm:$0xf]  ;;  %v410_v16 = vor.u32 %v461_v13, %v409_v10  ;;  %v405_v17 = vld [vmem:[#allocation5 + $0x7c] sm:$0xf]  ;;  %v460_v18 = vld [vmem:[#allocation5 + $0x84] sm:$0xf0] }
  0x14   :  { %216 = vmatpush.bf16.msra.mxu1 %v414_v12  ;;  %v370_v19 = vor.u32 %v451_v15, %v369_v14  ;;  %v365_v20 = vld [vmem:[#allocation5 + $0x48] sm:$0xf]  ;;  %v450_v21 = vld [vmem:[#allocation5 + $0x50] sm:$0xf0]  ;;  %v406_v22 = vor.u32 %v460_v18, %v405_v17  ;;  %v401_v23 = vld [vmem:[#allocation5 + $0x64] sm:$0xf] }
  0x15   :  { %v459_v24 = vld [vmem:[#allocation5 + $0x6c] sm:$0xf0]  ;;  %v366_v25 = vor.u32 %v450_v21, %v365_v20  ;;  %v449_v27 = vld [vmem:[#allocation5 + $0x38] sm:$0xf0]  ;;  %v357_v30 = vld [vmem:[#allocation5 + $0x18] sm:$0xf] }
  0x16   :  { %132 = vmatpush.bf16.msra.mxu0 %v378_v5  ;;  %v361_v26 = vld [vmem:[#allocation5 + $0x30] sm:$0xf]  ;;  %v402_v28 = vor.u32 %v459_v24, %v401_v23  ;;  %v448_v31 = vld [vmem:[#allocation5 + $0x20] sm:$0xf0]  ;;  %v353_v33 = vld [vmem:[#allocation5] sm:$0xf] }
  0x17   :  { %v362_v29 = vor.u32 %v449_v27, %v361_v26  ;;  %v358_v32 = vor.u32 %v448_v31, %v357_v30  ;;  %v447_v34 = vld [vmem:[#allocation5 + $0x8] sm:$0xf0]  ;;  %v60_v36 = vld [vmem:[#allocation2] sm:$0xff]  ;;  %v61_v37 = vld [vmem:[#allocation2 + $0x8] sm:$0xff]  ;;  %s606_s0 = smov [#allocation8]   ;;  %s337_s5 = sshll.u32 %s644_s3, 4  ;;  %s338_s5 = int_to_ptr.hbm [resolvable:$true] %s337_s5 }
  0x18   :  { %217 = vmatpush.bf16.msra.mxu1 %v410_v16  ;;  %v354_v35 = vor.u32 %v447_v34, %v353_v33  ;;  %v62_v38 = vpack.c.bf16 %v61_v37, %v60_v36  ;;  %v397_v39 = vld [vmem:[#allocation5 + $0x4c] sm:$0xf]  ;;  %v458_v40 = vld [vmem:[#allocation5 + $0x54] sm:$0xf0]  ;;  %v393_v42 = vld [vmem:[#allocation5 + $0x34] sm:$0xf] }
  0x19   :  { %v398_v41 = vor.u32 %v458_v40, %v397_v39  ;;  %v457_v43 = vld [vmem:[#allocation5 + $0x3c] sm:$0xf0]  ;;  %v389_v45 = vld [vmem:[#allocation5 + $0x1c] sm:$0xf]  ;;  %v456_v46 = vld [vmem:[#allocation5 + $0x24] sm:$0xf0] }
  0x1a   :  { %133 = vmatpush.bf16.msra.mxu0 %v374_v11  ;;  %v394_v44 = vor.u32 %v457_v43, %v393_v42  ;;  %v390_v47 = vor.u32 %v456_v46, %v389_v45  ;;  %v385_v48 = vld [vmem:[#allocation5 + $0x4] sm:$0xf]  ;;  %v455_v49 = vld [vmem:[#allocation5 + $0xc] sm:$0xf0]  ;;  %v470_v52 = vld [vmem:[#allocation5 + $0xb8] sm:$0xf0] }
  0x1b   :  { %v386_v50 = vor.u32 %v455_v49, %v385_v48  ;;  %v445_v51 = vld [vmem:[#allocation5 + $0xb0] sm:$0xf]  ;;  %v441_v53 = vld [vmem:[#allocation5 + $0x98] sm:$0xf]  ;;  %v469_v55 = vld [vmem:[#allocation5 + $0xa0] sm:$0xf0] }
  0x1c   :  { %218 = vmatpush.bf16.msra.mxu1 %v406_v22  ;;  %v446_v54 = vor.u32 %v470_v52, %v445_v51  ;;  %v442_v56 = vor.u32 %v469_v55, %v441_v53  ;;  %v437_v57 = vld [vmem:[#allocation5 + $0x80] sm:$0xf]  ;;  %v468_v58 = vld [vmem:[#allocation5 + $0x88] sm:$0xf0]  ;;  %v433_v60 = vld [vmem:[#allocation5 + $0x68] sm:$0xf] }
  0x1d   :  { %v438_v59 = vor.u32 %v468_v58, %v437_v57  ;;  %v467_v61 = vld [vmem:[#allocation5 + $0x70] sm:$0xf0]  ;;  %v486_v0 = vld [vmem:[#allocation7] ss:$0 sm:$0xff]  ;;  %v429_v7 = vld [vmem:[#allocation5 + $0x50] sm:$0xf] }
  0x1e   :  { %134 = vmatpush.bf16.msra.mxu0 %v370_v19  ;;  %301 = vmatpush.bf16.msra.mxu2 %v446_v54  ;;  %v434_v62 = vor.u32 %v467_v61, %v433_v60  ;;  %v466_v8 = vld [vmem:[#allocation5 + $0x58] sm:$0xf0]  ;;  %v425_v10 = vld [vmem:[#allocation5 + $0x38] sm:$0xf]  ;;  %v465_v11 = vld [vmem:[#allocation5 + $0x40] sm:$0xf0] }
  0x1f   :  { %v430_v9 = vor.u32 %v466_v8, %v429_v7  ;;  %v426_v12 = vor.u32 %v465_v11, %v425_v10  ;;  %v421_v13 = vld [vmem:[#allocation5 + $0x20] sm:$0xf]  ;;  %v464_v14 = vld [vmem:[#allocation5 + $0x28] sm:$0xf0]  ;;  %v417_v16 = vld [vmem:[#allocation5 + $0x8] sm:$0xf] }
  0x20   :  { %219 = vmatpush.bf16.msra.mxu1 %v402_v28  ;;  %v422_v15 = vor.u32 %v464_v14, %v421_v13  ;;  %v463_v17 = vld [vmem:[#allocation5 + $0x10] sm:$0xf0]  ;;  %v487_v20 = vld [vmem:[#allocation7 + $0x1] ss:$0 sm:$0xff]  ;;  %v488_v27 = vld [vmem:[#allocation7 + $0x2] ss:$0 sm:$0xff] }
  0x21   :  { %v418_v18 = vor.u32 %v463_v17, %v417_v16  ;;  %s335_s2 = sshll.u32 %s606_s0, 4  ;;  %s607_s6 = smov 64   ;;  %s336_s2 = int_to_ptr.vmem [resolvable:$true] %s335_s2 }
  0x22   :  { %135 = vmatpush.bf16.msra.mxu0 %v366_v25  ;;  %302 = vmatpush.bf16.msra.mxu2 %v442_v56  ;;  %s608_s7 = smov 4  }
  0x24   :  { %220 = vmatpush.bf16.msra.mxu1 %v398_v41 }
  0x26   :  { %136 = vmatpush.bf16.msra.mxu0 %v362_v29  ;;  %303 = vmatpush.bf16.msra.mxu2 %v438_v59 }
  0x28   :  { %221 = vmatpush.bf16.msra.mxu1 %v394_v44 }
  0x2a   :  { %137 = vmatpush.bf16.msra.mxu0 %v358_v32  ;;  %304 = vmatpush.bf16.msra.mxu2 %v434_v62 }
  0x2c   :  { %222 = vmatpush.bf16.msra.mxu1 %v390_v47 }
  0x2e   :  { %138 = vmatpush.bf16.msra.mxu0 %v354_v35  ;;  %305 = vmatpush.bf16.msra.mxu2 %v430_v9 }
  0x30   :  { %223 = vmatpush.bf16.msra.mxu1 %v386_v50 }
  0x31   :  { %139 = vmatmul.bf16.vlgmr.msra.gmra.mxu0 %v62_v38 }
  0x32   :  { %306 = vmatpush.bf16.msra.mxu2 %v426_v12 }
  0x36   :  { %307 = vmatpush.bf16.msra.mxu2 %v422_v15 }
  0x3a   :  { %308 = vmatpush.bf16.msra.mxu2 %v418_v18 }
  0xae   :  { %v140_v63 = vpop.f32.mrf.mxu0 }
  0xaf   :  { %v141_v1 = vadd.f32 %v486_v0, %v140_v63 }
  0xb1   :  { %v145_v4 = vmax.f32 %v141_v1, 0.0 }
  0xb6   :  { %v142_v2 = vpop.f32.mrf.mxu0 }
  0xb7   :  { %v143_v3 = vadd.f32 %v486_v0, %v142_v2 }
  0xb9   :  { %v146_v5 = vmax.f32 %v143_v3, 0.0 }
  0xbb   :  { %v147_v6 = vpack.c.bf16 %v146_v5, %v145_v4 }
  0xbd   :  { %224 = vmatmul.bf16.vlgmr.msra.gmra.mxu1 %v147_v6 }
 0x13a   :  { %v225_v19 = vpop.f32.mrf.mxu1 }
 0x13b   :  { %v226_v21 = vadd.f32 %v487_v20, %v225_v19 }
 0x13d   :  { %v230_v24 = vmax.f32 %v226_v21, 0.0 }
 0x142   :  { %v227_v22 = vpop.f32.mrf.mxu1 }
 0x143   :  { %v228_v23 = vadd.f32 %v487_v20, %v227_v22 }
 0x145   :  { %v231_v25 = vmax.f32 %v228_v23, 0.0 }
 0x147   :  { %v232_v26 = vpack.c.bf16 %v231_v25, %v230_v24 }
 0x149   :  { %309 = vmatmul.bf16.vlgmr.msra.gmra.mxu2 %v232_v26 }
 0x1cc   :  { %v310_v28 = vpop.f32.mrf.mxu2 }
 0x1cd   :  { %v311_v29 = vadd.f32 %v488_v27, %v310_v28 }
 0x1cf   :  { %v315_v30 = vsub.f32 0.0, %v311_v29 }
 0x1d1   :  { %v317_v31 = vmul.f32 1.442695, %v315_v30 }
 0x1d3   :  { %489 = vpow2.f32 %v317_v31 }
 0x1d4   :  { %v312_v32 = vpop.f32.mrf.mxu2 }
 0x1d5   :  { %v313_v33 = vadd.f32 %v488_v27, %v312_v32 }
 0x1d7   :  { %v316_v34 = vsub.f32 0.0, %v313_v33 }
 0x1d9   :  { %v319_v35 = vmul.f32 1.442695, %v316_v34  ;;  %v490_v36 = vpop.eup %489 }
 0x1da   :  { %v321_v37 = vadd.f32 1.0, %v490_v36 }
 0x1db   :  { %491 = vpow2.f32 %v319_v35 }
 0x1dc   :  { %493 = vrcp.f32 %v321_v37 }
 0x1e1   :  { %v492_v38 = vpop.eup %491 }
 0x1e2   :  { %v322_v39 = vadd.f32 1.0, %v492_v38  ;;  %v494_v40 = vpop.eup %493 }
 0x1e3   :  { %v325_v42 = vmul.f32 3.1415927, %v494_v40 }
 0x1e4   :  { %495 = vrcp.f32 %v322_v39 }
 0x1ea   :  { %v496_v41 = vpop.eup %495 }
 0x1eb   :  { %v326_v43 = vmul.f32 3.1415927, %v496_v41 }
 0x1ed   :  { %v474_v44 = vpack.c.bf16 %v326_v43, %v325_v42 }
 0x1ef   :  { %475 = vst [vmem:[#allocation8] sm:$0xff] %v474_v44  }
 0x1f0   :  { %343 = dma.vmem_to_hbm [thread:$0]  %s336_s2, 128, %s338_s5, [#allocation4], %s607_s6, %s607_s6, %s608_s7  }
 0x1f1   :  { %597 = dma.done.wait [#allocation4], 128  }
 0x1f2   :  { %598 = vsyncadd [#allocation4], 4294967168 }
 0x1f3   :  { %348 = vsyncpa [#allocation3], 1 }
 0x1f4   :  { %349 = vsyncpa [#allocation6], 1 }
 0x1f5   :  { %350 = vsyncpa [#allocation4], 1 }

</bundles_post_ra>
